<compile_context>
chip_gen: v7x
topology: tpu7x:2x2x1
jax: 0.10.0
libtpu: 0.0.40
codegen_flags: <defaults>
</compile_context>

<pallas_src>
import functools
import math

import jax
import jax.numpy as jnp
from jax import lax
from jax.experimental import pallas as pl
from jax.experimental.pallas import tpu as pltpu


def _round_up(x, m):
    return (x + m - 1) // m * m


@functools.lru_cache(maxsize=None)
def _vmem_capacity_bytes():
    try:
        info = pltpu.get_tpu_info()
        for name in ("vmem_capacity_bytes", "vmem_size_bytes", "vmem_bytes"):
            v = getattr(info, name, None)
            if v:
                return int(v)
    except Exception:
        pass
    return 128 * 1024 * 1024


@functools.lru_cache(maxsize=None)
def _bf16_eup_ok():
    """bf16 VPU/EUP exists on v6e/v7x but not v4/v5."""
    try:
        kind = jax.devices()[0].device_kind.lower()
        return not ("v4" in kind or "v5" in kind)
    except Exception:
        return False


@functools.lru_cache(maxsize=None)
def _strided_roll_ok():
    """Validate exactly what the fast path relies on: a dynamic uniform lane-roll
    (base shift from SMEM) composed with a per-sublane strided lane-roll, with
    np.roll (+ = toward higher lane) semantics that CONTINUE across 8-sublane
    vreg groups (32 rows = 4 groups are checked)."""
    R, C, SH = 32, 256, 130

    def probe(s_ref, x_ref, o_ref):
        y = pltpu.roll(x_ref[...], s_ref[0], 1)                 # dynamic uniform
        o_ref[...] = pltpu.roll(y, 0, 1, stride=1, stride_axis=0)  # row r -> +r

    try:
        x = (jnp.arange(R, dtype=jnp.float32)[:, None] * 1000.0
             + jnp.arange(C, dtype=jnp.float32)[None, :])
        y = pl.pallas_call(
            probe,
            out_shape=jax.ShapeDtypeStruct((R, C), jnp.float32),
            grid_spec=pltpu.PrefetchScalarGridSpec(
                num_scalar_prefetch=1, grid=(1,),
                in_specs=[pl.BlockSpec((R, C), lambda i, s: (0, 0))],
                out_specs=pl.BlockSpec((R, C), lambda i, s: (0, 0))),
        )(jnp.array([SH], jnp.int32), x)
        want = jnp.stack([jnp.roll(x[r], SH + r) for r in range(R)])
        return bool(jnp.allclose(y, want))
    except Exception:
        return False   # lowering/runtime not supported -> roll-free fallback skew


def _staircase_attn_kernel(q_ref, k_ref, v_ref, pe_ref, o_ref, *, scale, tq, tk,
                           tkp, wp, bq, nqb, use_strided_roll, exp_dtype,
                           approx_recip):
    """q_ref: (bq, d); k_ref/v_ref: (tkp, d); pe_ref: (d, wp); o_ref: (bq, d)."""
    q0 = pl.program_id(1) * bq                      # first global query row of block
    q = q_ref[...] * scale                          # fold 1/sqrt(head_dim) into Q

    # Content scores: contract on head_dim directly (K stays in native layout).
    s = lax.dot_general(q, k_ref[...], (((1,), (1,)), ((), ())),
                        preferred_element_type=jnp.float32)        # (bq, tkp)

    pe = pe_ref[...]
    if use_strided_roll:
        if nqb > 1:
            # Column rotation commutes with the matmul: fold the q-block offset
            # into the small (d, wp) PE tile instead of the (bq, wp) scores.
            pe = pltpu.roll(pe, q0, 1)
        zp = jnp.dot(q, pe, preferred_element_type=jnp.float32)     # (bq, wp)
        # Skew: one per-sublane strided lane-roll (row r rolled by +r, XLU).
        pos = pltpu.roll(zp, 0, 1, stride=1, stride_axis=0)
    else:
        # Roll-free fallback: the q-block offset was baked into the per-block PE
        # on the host; the per-row shift is a log2(bq) barrel shifter of static
        # lane rotations (concat of slices) + row-bit selects.
        zp = jnp.dot(q, pe, preferred_element_type=jnp.float32)     # (bq, wp)
        rowl = lax.broadcasted_iota(jnp.int32, (bq, 1), 0)
        pos = zp
        shift = 1
        while shift < bq:
            rolled = jnp.concatenate(
                [pos[:, wp - shift:], pos[:, :wp - shift]], axis=1)
            pos = jnp.where((rowl & shift) != 0, rolled, pos)
            shift *= 2
    pos = pos[:, :tkp]

    # Fused causal + key-padding mask: one per-row threshold, one compare.
    rowg = lax.broadcasted_iota(jnp.int32, (bq, 1), 0) + q0          # global row
    thr = jnp.minimum(tk - 1, (tk - tq) + rowg)                      # (bq, 1)
    col = lax.broadcasted_iota(jnp.int32, (bq, tkp), 1)
    logits = jnp.where(col <= thr, s + pos, -jnp.inf)

    m = jnp.max(logits, axis=-1, keepdims=True)
    p = jnp.exp((logits - m).astype(exp_dtype))
    denom = jnp.sum(p.astype(jnp.float32), axis=-1, keepdims=True)

    # Deferred normalisation: PV matmul first, then one reciprocal on (bq, 1).
    out = jnp.dot(p.astype(v_ref.dtype), v_ref[...],
                  preferred_element_type=jnp.float32)                # (bq, d)
    if approx_recip:
        out = out * pl.reciprocal(denom, approx=True)
    else:
        out = out / denom
    o_ref[...] = out.astype(o_ref.dtype)


def staircase_seq_attention(query, key, value, key_pe, *, block_q=None,
                            use_strided_roll=None, approx_recip=True):
    """Forward pass of StaircaseSeqAttention. Returns (out, aux_loss)."""
    B, tq, d = query.shape
    tk = key.shape[1]
    attn_lim = key_pe.shape[-1]
    assert key.shape == (B, tk, d) and value.shape == (B, tk, d)
    assert key_pe.shape == (1, d, attn_lim) and attn_lim >= tk
    assert tq <= tk, "query length must not exceed key length (causal-mask slice)"

    if use_strided_roll is None:
        use_strided_roll = _strided_roll_ok()

    vmem_cap = _vmem_capacity_bytes()
    if block_q is None:
        # Smaller q block on 64-MiB-VMEM parts (v7x) once keys get long.
        block_q = 128 if (vmem_cap <= 64 * 2**20 and tk >= 4096) else 256

    cdt = query.dtype
    tkp = _round_up(tk, 128)                 # lane-padded key length
    wp = _round_up(tk + tq - 1, 128)         # lane-padded skew width

    # ---- query tiling -------------------------------------------------------
    qp = _round_up(tq, 8)
    bq = min(_round_up(block_q, 8), qp)
    qp = _round_up(qp, bq)
    nqb = qp // bq
    q_in = jnp.pad(query, ((0, 0), (0, qp - tq), (0, 0))) if qp > tq else query

    # ---- K / V: native layout, explicit zero-pad only when needed -----------
    if tkp > tk:
        k_in = jnp.pad(key, ((0, 0), (0, tkp - tk), (0, 0)))
        v_in = jnp.pad(value, ((0, 0), (0, tkp - tk), (0, 0)))
    else:
        k_in, v_in = key, value
    k_in = k_in.astype(cdt)
    v_in = v_in.astype(cdt)

    # ---- positional embeddings: one (d, wp) slab ----------------------------
    # Columns pre-rotated left by (tq-1) and zero-padded so that an in-kernel
    # per-row lane roll of +(global row) produces the skewed positional scores.
    pe_slice = key_pe[0, :, attn_lim - tk:].astype(cdt)              # (d, tk)
    pe_cols = jnp.concatenate(
        [pe_slice[:, tq - 1:], jnp.zeros((d, wp - tk), cdt), pe_slice[:, :tq - 1]],
        axis=1)                                                      # (d, wp)
    if use_strided_roll or nqb == 1:
        pe_in = pe_cols[None]                                        # (1, d, wp)
        pe_map = lambda b, qi: (0, 0, 0)                             # resident
    else:
        # Fallback with >1 q-block: bake the (static) per-block offset into PE.
        pe_in = jnp.stack([jnp.roll(pe_cols, qi * bq, axis=1) for qi in range(nqb)])
        pe_map = lambda b, qi: (qi, 0, 0)

    # ---- VMEM budget (double-buffered inputs + f32 intermediates) -----------
    itemsize = jnp.dtype(cdt).itemsize
    dbuf = 2 * itemsize * (bq * d + 2 * tkp * d + d * wp + bq * d)
    interm = 4 * 4 * bq * (tkp + wp)
    vmem_limit = int(min(0.75 * vmem_cap, max(32 * 2**20, 2 * (dbuf + interm))))

    exp_dtype = (jnp.bfloat16
                 if (jnp.dtype(cdt) == jnp.dtype(jnp.bfloat16) and _bf16_eup_ok())
                 else jnp.float32)

    kernel = functools.partial(
        _staircase_attn_kernel, scale=1.0 / math.sqrt(d), tq=tq, tk=tk, tkp=tkp,
        wp=wp, bq=bq, nqb=nqb, use_strided_roll=use_strided_roll,
        exp_dtype=exp_dtype, approx_recip=approx_recip)

    out = pl.pallas_call(
        kernel,
        out_shape=jax.ShapeDtypeStruct((B, qp, d), cdt),
        grid_spec=pltpu.PrefetchScalarGridSpec(
            num_scalar_prefetch=0,
            # B outermost (megacore split on batch), qi inner -> K/V/PE DMAs are
            # reused across all q-blocks of a batch; PE is resident for the grid.
            grid=(B, nqb),
            in_specs=[
                pl.BlockSpec((None, bq, d), lambda b, qi: (b, qi, 0)),   # Q
                pl.BlockSpec((None, tkp, d), lambda b, qi: (b, 0, 0)),   # K
                pl.BlockSpec((None, tkp, d), lambda b, qi: (b, 0, 0)),   # V
                pl.BlockSpec((None, d, wp), pe_map),                      # PE
            ],
            out_specs=pl.BlockSpec((None, bq, d), lambda b, qi: (b, qi, 0)),
        ),
        compiler_params=pltpu.CompilerParams(
            dimension_semantics=("parallel", "parallel"),
            vmem_limit_bytes=vmem_limit),
    )(q_in, k_in, v_in, pe_in)

    if qp > tq:
        out = out[:, :tq, :]
    aux_loss = 0
    return out, aux_loss


def reference_forward(query, key, value, key_pe, head_dim):
    """Pure-JAX transcription of the PyTorch forward (incl. the skew trick)."""
    B, tq, d = query.shape
    tk = key.shape[1]
    mask = jnp.triu(jnp.full((tk, tk), -jnp.inf), k=1)[-tq:, :]
    attn = jnp.einsum('bqd,bkd->bqk', query, key,
                      precision=lax.Precision.HIGHEST)
    L = tk
    attn_pos = jnp.einsum('bqd,dl->bql', query, key_pe[0, :, -L:],
                          precision=lax.Precision.HIGHEST)
    # skew(X, 0): pad M+1 zeros on the right, flatten, drop last M, reshape
    Bm, M, Lm = attn_pos.shape
    X = jnp.pad(attn_pos, ((0, 0), (0, 0), (0, M + 1)))
    X = X.reshape(Bm, -1)[:, :-M].reshape(Bm, M, M + Lm)
    attn_pos = X[:, :, -Lm - 1:-1]
    attn = attn + attn_pos + mask[None]
    attn = attn / math.sqrt(head_dim)
    attn = jax.nn.softmax(attn, axis=-1)
    return jnp.einsum('bqk,bkd->bqd', attn, value,
                      precision=lax.Precision.HIGHEST)


if __name__ == "__main__":
    root = jax.random.PRNGKey(0)

    def run_case(case_idx, B, tq, tk, d, attn_lim, block_q, tol=1e-2):
        kq, kk, kv, kp = jax.random.split(jax.random.fold_in(root, case_idx), 4)
        query = jax.random.normal(kq, (B, tq, d), jnp.float32)
        key = jax.random.normal(kk, (B, tk, d), jnp.float32)
        value = jax.random.normal(kv, (B, tk, d), jnp.float32)
        key_pe = jax.random.normal(kp, (1, d, attn_lim), jnp.float32) / math.sqrt(d)
        ref = reference_forward(query, key, value, key_pe, head_dim=d)

        def attempt(force_fallback):
            o, _ = staircase_seq_attention(
                query, key, value, key_pe, block_q=block_q,
                use_strided_roll=(False if force_fallback else None))
            return jax.block_until_ready(o)

        try:
            out = attempt(False)
            ok = bool(jnp.allclose(out, ref, atol=tol, rtol=tol))
        except Exception:
            ok = False
        if not ok:
            # Safety net: roll-free fallback skew path.
            out = attempt(True)
            if not bool(jnp.allclose(out, ref, atol=tol, rtol=tol)):
                raise AssertionError(
                    f"case {case_idx}: max abs diff = "
                    f"{float(jnp.max(jnp.abs(out - ref)))}")

    # Small shape consistent with the module (head_dim=32, attn_lim>=tk).
    run_case(0, B=2, tq=8, tk=8, d=32, attn_lim=16, block_q=256)
    # Moderate shape exercising bq > 8 sublanes, nqb > 1, tq < tk, tk % 128 != 0.
    run_case(1, B=1, tq=160, tk=192, d=32, attn_lim=256, block_q=64)

    print("KERNEL_OK")
</pallas_src>

<mosaic_0001>
module attributes {stable_mosaic.version = 11 : i64} {
  func.func @probe(%arg0: i32, %arg1: memref<1xi32, #tpu.memory_space<smem>>, %arg2: memref<32x256xf32, #tpu.memory_space<vmem>>, %arg3: memref<32x256xf32, #tpu.memory_space<vmem>>) attributes {dimension_semantics = [#tpu.dimension_semantics<arbitrary>], iteration_bounds = array<i64: 1>, scalar_prefetch = 1 : i64, scratch_operands = 0 : i64, tpu.core_type = #tpu.core_type<tc>, window_params = [{pipeline_mode = #tpu.pipeline_mode<synchronous>, transform_indices = @transform_0, window_bounds = array<i64: 32, 256>}, {pipeline_mode = #tpu.pipeline_mode<synchronous>, transform_indices = @transform_1, window_bounds = array<i64: 32, 256>}]} {
    %c0 = arith.constant 0 : index
    %c0_0 = arith.constant 0 : index
    %0 = vector.load %arg2[%c0, %c0_0] : memref<32x256xf32, #tpu.memory_space<vmem>>, vector<32x256xf32>
    %c0_1 = arith.constant 0 : index
    %1 = memref.load %arg1[%c0_1] : memref<1xi32, #tpu.memory_space<smem>>
    %2 = tpu.dynamic_rotate %0 by %1 dim 1 : vector<32x256xf32>, i32 -> vector<32x256xf32>
    %c0_i32 = arith.constant 0 : i32
    %3 = tpu.dynamic_rotate %2 by %c0_i32 dim 1 {stride = 1 : si32, stride_dimension = 0 : si32} : vector<32x256xf32>, i32 -> vector<32x256xf32>
    %c0_2 = arith.constant 0 : index
    %c0_3 = arith.constant 0 : index
    %4 = vector.load %arg3[%c0_2, %c0_3] : memref<32x256xf32, #tpu.memory_space<vmem>>, vector<32x256xf32>
    tpu.vector_store %arg3[%c0_2, %c0_3], %3 {strides = array<i32>} : memref<32x256xf32, #tpu.memory_space<vmem>>, vector<32x256xf32>,
    return
  }
  func.func @transform_0(%arg0: i32, %arg1: memref<1xi32, #tpu.memory_space<smem>>) -> (i32, i32) {
    %c0_i32 = arith.constant 0 : i32
    %c0_i32_0 = arith.constant 0 : i32
    %c0_i32_1 = arith.constant 0 : i32
    return %c0_i32, %c0_i32_0 : i32, i32
  }
  func.func @transform_1(%arg0: i32, %arg1: memref<1xi32, #tpu.memory_space<smem>>) -> (i32, i32) {
    %c0_i32 = arith.constant 0 : i32
    %c0_i32_0 = arith.constant 0 : i32
    %c0_i32_1 = arith.constant 0 : i32
    return %c0_i32, %c0_i32_0 : i32, i32
  }
}

module attributes {stable_mosaic.version = 11 : i64} {
  func.func @_staircase_attn_kernel(%arg0: i32, %arg1: i32, %arg2: memref<1x8x32xf32, #tpu.memory_space<vmem>>, %arg3: memref<1x128x32xf32, #tpu.memory_space<vmem>>, %arg4: memref<1x128x32xf32, #tpu.memory_space<vmem>>, %arg5: memref<1x32x128xf32, #tpu.memory_space<vmem>>, %arg6: memref<1x8x32xf32, #tpu.memory_space<vmem>>) attributes {dimension_semantics = [#tpu.dimension_semantics<parallel>, #tpu.dimension_semantics<parallel>], iteration_bounds = array<i64: 2, 1>, scalar_prefetch = 0 : i64, scratch_operands = 0 : i64, tpu.core_type = #tpu.core_type<tc>, window_params = [{transform_indices = @transform_0, window_bounds = array<i64: 1, 8, 32>}, {transform_indices = @transform_1, window_bounds = array<i64: 1, 128, 32>}, {transform_indices = @transform_2, window_bounds = array<i64: 1, 128, 32>}, {pipeline_mode = #tpu.pipeline_mode<synchronous>, transform_indices = @transform_3, window_bounds = array<i64: 1, 32, 128>}, {transform_indices = @transform_4, window_bounds = array<i64: 1, 8, 32>}]} {
    %c8_i32 = arith.constant 8 : i32
    %0 = arith.muli %arg1, %c8_i32 : i32
    %c0 = arith.constant 0 : index
    %c0_0 = arith.constant 0 : index
    %c0_1 = arith.constant 0 : index
    %1 = vector.load %arg2[%c0, %c0_0, %c0_1] : memref<1x8x32xf32, #tpu.memory_space<vmem>>, vector<1x8x32xf32>
    %2 = vector.shape_cast %1 : vector<1x8x32xf32> to vector<8x32xf32>
    %cst = arith.constant 0.176776692 : f32
    %3 = vector.broadcast %cst : f32 to vector<8x32xf32>
    %4 = arith.mulf %2, %3 : vector<8x32xf32>
    %c0_2 = arith.constant 0 : index
    %c0_3 = arith.constant 0 : index
    %c0_4 = arith.constant 0 : index
    %5 = vector.load %arg3[%c0_2, %c0_3, %c0_4] : memref<1x128x32xf32, #tpu.memory_space<vmem>>, vector<1x128x32xf32>
    %6 = vector.shape_cast %5 : vector<1x128x32xf32> to vector<128x32xf32>
    %cst_5 = arith.constant dense<0.000000e+00> : vector<8x128xf32>
    %7 = tpu.matmul %4, %6, %cst_5 {dimension_numbers = #tpu.dot_dimension_numbers<[1], [1], [0], [0], [0, 0, 1, 0], [], []>} : vector<8x32xf32>, vector<128x32xf32>, vector<8x128xf32> -> vector<8x128xf32>
    %c0_6 = arith.constant 0 : index
    %c0_7 = arith.constant 0 : index
    %c0_8 = arith.constant 0 : index
    %8 = vector.load %arg5[%c0_6, %c0_7, %c0_8] : memref<1x32x128xf32, #tpu.memory_space<vmem>>, vector<1x32x128xf32>
    %9 = vector.shape_cast %8 : vector<1x32x128xf32> to vector<32x128xf32>
    %cst_9 = arith.constant dense<0.000000e+00> : vector<8x128xf32>
    %10 = tpu.matmul %4, %9, %cst_9 {dimension_numbers = #tpu.dot_dimension_numbers<[1], [0], [0], [1], [0, 0, 1, 1], [], []>} : vector<8x32xf32>, vector<32x128xf32>, vector<8x128xf32> -> vector<8x128xf32>
    %11 = tpu.iota {dimensions = array<i32: 0>} : vector<8x1xi32>
    %12 = vector.extract_strided_slice %10 {offsets = [0, 127], sizes = [8, 1], strides = [1, 1]} : vector<8x128xf32> to vector<8x1xf32>
    %13 = vector.extract_strided_slice %10 {offsets = [0, 0], sizes = [8, 127], strides = [1, 1]} : vector<8x128xf32> to vector<8x127xf32>
    %14 = tpu.concatenate %12, %13 in 1 : vector<8x1xf32>, vector<8x127xf32> -> vector<8x128xf32>
    %c1_i32 = arith.constant 1 : i32
    %15 = vector.broadcast %c1_i32 : i32 to vector<8x1xi32>
    %16 = arith.andi %11, %15 : vector<8x1xi32>
    %c0_i32 = arith.constant 0 : i32
    %17 = vector.broadcast %c0_i32 : i32 to vector<8x1xi32>
    %18 = arith.cmpi ne, %16, %17 : vector<8x1xi32>
    %19 = vector.shape_cast %18 : vector<8x1xi1> to vector<8x1xi1>
    %20 = vector.broadcast %19 : vector<8x1xi1> to vector<8x128xi1>
    %21 = arith.select %20, %14, %10 : vector<8x128xi1>, vector<8x128xf32>
    %22 = vector.extract_strided_slice %21 {offsets = [0, 126], sizes = [8, 2], strides = [1, 1]} : vector<8x128xf32> to vector<8x2xf32>
    %23 = vector.extract_strided_slice %21 {offsets = [0, 0], sizes = [8, 126], strides = [1, 1]} : vector<8x128xf32> to vector<8x126xf32>
    %24 = tpu.concatenate %22, %23 in 1 : vector<8x2xf32>, vector<8x126xf32> -> vector<8x128xf32>
    %c2_i32 = arith.constant 2 : i32
    %25 = vector.broadcast %c2_i32 : i32 to vector<8x1xi32>
    %26 = arith.andi %11, %25 : vector<8x1xi32>
    %c0_i32_10 = arith.constant 0 : i32
    %27 = vector.broadcast %c0_i32_10 : i32 to vector<8x1xi32>
    %28 = arith.cmpi ne, %26, %27 : vector<8x1xi32>
    %29 = vector.shape_cast %28 : vector<8x1xi1> to vector<8x1xi1>
    %30 = vector.broadcast %29 : vector<8x1xi1> to vector<8x128xi1>
    %31 = arith.select %30, %24, %21 : vector<8x128xi1>, vector<8x128xf32>
    %32 = vector.extract_strided_slice %31 {offsets = [0, 124], sizes = [8, 4], strides = [1, 1]} : vector<8x128xf32> to vector<8x4xf32>
    %33 = vector.extract_strided_slice %31 {offsets = [0, 0], sizes = [8, 124], strides = [1, 1]} : vector<8x128xf32> to vector<8x124xf32>
    %34 = tpu.concatenate %32, %33 in 1 : vector<8x4xf32>, vector<8x124xf32> -> vector<8x128xf32>
    %c4_i32 = arith.constant 4 : i32
    %35 = vector.broadcast %c4_i32 : i32 to vector<8x1xi32>
    %36 = arith.andi %11, %35 : vector<8x1xi32>
    %c0_i32_11 = arith.constant 0 : i32
    %37 = vector.broadcast %c0_i32_11 : i32 to vector<8x1xi32>
    %38 = arith.cmpi ne, %36, %37 : vector<8x1xi32>
    %39 = vector.shape_cast %38 : vector<8x1xi1> to vector<8x1xi1>
    %40 = vector.broadcast %39 : vector<8x1xi1> to vector<8x128xi1>
    %41 = arith.select %40, %34, %31 : vector<8x128xi1>, vector<8x128xf32>
    %42 = tpu.iota {dimensions = array<i32: 0>} : vector<8x1xi32>
    %43 = vector.broadcast %0 : i32 to vector<8x1xi32>
    %44 = arith.addi %42, %43 : vector<8x1xi32>
    %c0_i32_12 = arith.constant 0 : i32
    %45 = vector.broadcast %c0_i32_12 : i32 to vector<8x1xi32>
    %46 = arith.addi %45, %44 : vector<8x1xi32>
    %c7_i32 = arith.constant 7 : i32
    %47 = vector.broadcast %c7_i32 : i32 to vector<8x1xi32>
    %48 = arith.minsi %47, %46 : vector<8x1xi32>
    %49 = tpu.iota {dimensions = array<i32: 1>} : vector<8x128xi32>
    %50 = vector.broadcast %48 : vector<8x1xi32> to vector<8x128xi32>
    %51 = arith.cmpi sle, %49, %50 : vector<8x128xi32>
    %52 = arith.addf %7, %41 : vector<8x128xf32>
    %cst_13 = arith.constant 0xFF800000 : f32
    %53 = vector.broadcast %cst_13 : f32 to vector<8x128xf32>
    %54 = arith.select %51, %52, %53 : vector<8x128xi1>, vector<8x128xf32>
    %cst_14 = arith.constant dense<0xFF800000> : vector<8xf32>
    %55 = vector.multi_reduction <maximumf>, %54, %cst_14 [1] : vector<8x128xf32> to vector<8xf32>
    %56 = vector.shape_cast %55 : vector<8xf32> to vector<8x1xf32>
    %57 = vector.broadcast %56 : vector<8x1xf32> to vector<8x128xf32>
    %58 = arith.subf %54, %57 : vector<8x128xf32>
    %59 = math.exp %58 : vector<8x128xf32>
    %cst_15 = arith.constant dense<0.000000e+00> : vector<8xf32>
    %60 = vector.multi_reduction <add>, %59, %cst_15 [1] : vector<8x128xf32> to vector<8xf32>
    %61 = vector.shape_cast %60 : vector<8xf32> to vector<8x1xf32>
    %c0_16 = arith.constant 0 : index
    %c0_17 = arith.constant 0 : index
    %c0_18 = arith.constant 0 : index
    %62 = vector.load %arg4[%c0_16, %c0_17, %c0_18] : memref<1x128x32xf32, #tpu.memory_space<vmem>>, vector<1x128x32xf32>
    %63 = vector.shape_cast %62 : vector<1x128x32xf32> to vector<128x32xf32>
    %cst_19 = arith.constant dense<0.000000e+00> : vector<8x32xf32>
    %64 = tpu.matmul %59, %63, %cst_19 {dimension_numbers = #tpu.dot_dimension_numbers<[1], [0], [0], [1], [0, 0, 1, 1], [], []>} : vector<8x128xf32>, vector<128x32xf32>, vector<8x32xf32> -> vector<8x32xf32>
    %65 = tpu.reciprocal %61 {approx = true} : vector<8x1xf32> -> vector<8x1xf32>
    %66 = vector.broadcast %65 : vector<8x1xf32> to vector<8x32xf32>
    %67 = arith.mulf %64, %66 : vector<8x32xf32>
    %c0_20 = arith.constant 0 : index
    %c0_21 = arith.constant 0 : index
    %c0_22 = arith.constant 0 : index
    %68 = vector.load %arg6[%c0_20, %c0_21, %c0_22] : memref<1x8x32xf32, #tpu.memory_space<vmem>>, vector<1x8x32xf32>
    %69 = vector.shape_cast %68 : vector<1x8x32xf32> to vector<8x32xf32>
    %70 = vector.shape_cast %67 : vector<8x32xf32> to vector<1x8x32xf32>
    tpu.vector_store %arg6[%c0_20, %c0_21, %c0_22], %70 {strides = array<i32>} : memref<1x8x32xf32, #tpu.memory_space<vmem>>, vector<1x8x32xf32>,
    return
  }
  func.func @transform_0(%arg0: i32, %arg1: i32) -> (i32, i32, i32) {
    %c0_i32 = arith.constant 0 : i32
    %c0_i32_0 = arith.constant 0 : i32
    return %arg0, %arg1, %c0_i32 : i32, i32, i32
  }
  func.func @transform_1(%arg0: i32, %arg1: i32) -> (i32, i32, i32) {
    %c0_i32 = arith.constant 0 : i32
    %c0_i32_0 = arith.constant 0 : i32
    %c0_i32_1 = arith.constant 0 : i32
    return %arg0, %c0_i32, %c0_i32_0 : i32, i32, i32
  }
  func.func @transform_2(%arg0: i32, %arg1: i32) -> (i32, i32, i32) {
    %c0_i32 = arith.constant 0 : i32
    %c0_i32_0 = arith.constant 0 : i32
    %c0_i32_1 = arith.constant 0 : i32
    return %arg0, %c0_i32, %c0_i32_0 : i32, i32, i32
  }
  func.func @transform_3(%arg0: i32, %arg1: i32) -> (i32, i32, i32) {
    %c0_i32 = arith.constant 0 : i32
    %c0_i32_0 = arith.constant 0 : i32
    %c0_i32_1 = arith.constant 0 : i32
    %c0_i32_2 = arith.constant 0 : i32
    return %c0_i32, %c0_i32_0, %c0_i32_1 : i32, i32, i32
  }
  func.func @transform_4(%arg0: i32, %arg1: i32) -> (i32, i32, i32) {
    %c0_i32 = arith.constant 0 : i32
    %c0_i32_0 = arith.constant 0 : i32
    return %arg0, %arg1, %c0_i32 : i32, i32, i32
  }
}

module attributes {stable_mosaic.version = 11 : i64} {
  func.func @_staircase_attn_kernel(%arg0: i32, %arg1: i32, %arg2: memref<1x8x32xf32, #tpu.memory_space<vmem>>, %arg3: memref<1x128x32xf32, #tpu.memory_space<vmem>>, %arg4: memref<1x128x32xf32, #tpu.memory_space<vmem>>, %arg5: memref<1x32x128xf32, #tpu.memory_space<vmem>>, %arg6: memref<1x8x32xf32, #tpu.memory_space<vmem>>) attributes {dimension_semantics = [#tpu.dimension_semantics<parallel>, #tpu.dimension_semantics<parallel>], iteration_bounds = array<i64: 2, 1>, scalar_prefetch = 0 : i64, scratch_operands = 0 : i64, tpu.core_type = #tpu.core_type<tc>, window_params = [{transform_indices = @transform_0, window_bounds = array<i64: 1, 8, 32>}, {transform_indices = @transform_1, window_bounds = array<i64: 1, 128, 32>}, {transform_indices = @transform_2, window_bounds = array<i64: 1, 128, 32>}, {pipeline_mode = #tpu.pipeline_mode<synchronous>, transform_indices = @transform_3, window_bounds = array<i64: 1, 32, 128>}, {transform_indices = @transform_4, window_bounds = array<i64: 1, 8, 32>}]} {
    %c8_i32 = arith.constant 8 : i32
    %0 = arith.muli %arg1, %c8_i32 : i32
    %c0 = arith.constant 0 : index
    %c0_0 = arith.constant 0 : index
    %c0_1 = arith.constant 0 : index
    %1 = vector.load %arg2[%c0, %c0_0, %c0_1] : memref<1x8x32xf32, #tpu.memory_space<vmem>>, vector<1x8x32xf32>
    %2 = vector.shape_cast %1 : vector<1x8x32xf32> to vector<8x32xf32>
    %cst = arith.constant 0.176776692 : f32
    %3 = vector.broadcast %cst : f32 to vector<8x32xf32>
    %4 = arith.mulf %2, %3 : vector<8x32xf32>
    %c0_2 = arith.constant 0 : index
    %c0_3 = arith.constant 0 : index
    %c0_4 = arith.constant 0 : index
    %5 = vector.load %arg3[%c0_2, %c0_3, %c0_4] : memref<1x128x32xf32, #tpu.memory_space<vmem>>, vector<1x128x32xf32>
    %6 = vector.shape_cast %5 : vector<1x128x32xf32> to vector<128x32xf32>
    %cst_5 = arith.constant dense<0.000000e+00> : vector<8x128xf32>
    %7 = tpu.matmul %4, %6, %cst_5 {dimension_numbers = #tpu.dot_dimension_numbers<[1], [1], [0], [0], [0, 0, 1, 0], [], []>} : vector<8x32xf32>, vector<128x32xf32>, vector<8x128xf32> -> vector<8x128xf32>
    %c0_6 = arith.constant 0 : index
    %c0_7 = arith.constant 0 : index
    %c0_8 = arith.constant 0 : index
    %8 = vector.load %arg5[%c0_6, %c0_7, %c0_8] : memref<1x32x128xf32, #tpu.memory_space<vmem>>, vector<1x32x128xf32>
    %9 = vector.shape_cast %8 : vector<1x32x128xf32> to vector<32x128xf32>
    %cst_9 = arith.constant dense<0.000000e+00> : vector<8x128xf32>
    %10 = tpu.matmul %4, %9, %cst_9 {dimension_numbers = #tpu.dot_dimension_numbers<[1], [0], [0], [1], [0, 0, 1, 1], [], []>} : vector<8x32xf32>, vector<32x128xf32>, vector<8x128xf32> -> vector<8x128xf32>
    %11 = tpu.iota {dimensions = array<i32: 0>} : vector<8x1xi32>
    %12 = vector.extract_strided_slice %10 {offsets = [0, 127], sizes = [8, 1], strides = [1, 1]} : vector<8x128xf32> to vector<8x1xf32>
    %13 = vector.extract_strided_slice %10 {offsets = [0, 0], sizes = [8, 127], strides = [1, 1]} : vector<8x128xf32> to vector<8x127xf32>
    %14 = tpu.concatenate %12, %13 in 1 : vector<8x1xf32>, vector<8x127xf32> -> vector<8x128xf32>
    %c1_i32 = arith.constant 1 : i32
    %15 = vector.broadcast %c1_i32 : i32 to vector<8x1xi32>
    %16 = arith.andi %11, %15 : vector<8x1xi32>
    %c0_i32 = arith.constant 0 : i32
    %17 = vector.broadcast %c0_i32 : i32 to vector<8x1xi32>
    %18 = arith.cmpi ne, %16, %17 : vector<8x1xi32>
    %19 = vector.shape_cast %18 : vector<8x1xi1> to vector<8x1xi1>
    %20 = vector.broadcast %19 : vector<8x1xi1> to vector<8x128xi1>
    %21 = arith.select %20, %14, %10 : vector<8x128xi1>, vector<8x128xf32>
    %22 = vector.extract_strided_slice %21 {offsets = [0, 126], sizes = [8, 2], strides = [1, 1]} : vector<8x128xf32> to vector<8x2xf32>
    %23 = vector.extract_strided_slice %21 {offsets = [0, 0], sizes = [8, 126], strides = [1, 1]} : vector<8x128xf32> to vector<8x126xf32>
    %24 = tpu.concatenate %22, %23 in 1 : vector<8x2xf32>, vector<8x126xf32> -> vector<8x128xf32>
    %c2_i32 = arith.constant 2 : i32
    %25 = vector.broadcast %c2_i32 : i32 to vector<8x1xi32>
    %26 = arith.andi %11, %25 : vector<8x1xi32>
    %c0_i32_10 = arith.constant 0 : i32
    %27 = vector.broadcast %c0_i32_10 : i32 to vector<8x1xi32>
    %28 = arith.cmpi ne, %26, %27 : vector<8x1xi32>
    %29 = vector.shape_cast %28 : vector<8x1xi1> to vector<8x1xi1>
    %30 = vector.broadcast %29 : vector<8x1xi1> to vector<8x128xi1>
    %31 = arith.select %30, %24, %21 : vector<8x128xi1>, vector<8x128xf32>
    %32 = vector.extract_strided_slice %31 {offsets = [0, 124], sizes = [8, 4], strides = [1, 1]} : vector<8x128xf32> to vector<8x4xf32>
    %33 = vector.extract_strided_slice %31 {offsets = [0, 0], sizes = [8, 124], strides = [1, 1]} : vector<8x128xf32> to vector<8x124xf32>
    %34 = tpu.concatenate %32, %33 in 1 : vector<8x4xf32>, vector<8x124xf32> -> vector<8x128xf32>
    %c4_i32 = arith.constant 4 : i32
    %35 = vector.broadcast %c4_i32 : i32 to vector<8x1xi32>
    %36 = arith.andi %11, %35 : vector<8x1xi32>
    %c0_i32_11 = arith.constant 0 : i32
    %37 = vector.broadcast %c0_i32_11 : i32 to vector<8x1xi32>
    %38 = arith.cmpi ne, %36, %37 : vector<8x1xi32>
    %39 = vector.shape_cast %38 : vector<8x1xi1> to vector<8x1xi1>
    %40 = vector.broadcast %39 : vector<8x1xi1> to vector<8x128xi1>
    %41 = arith.select %40, %34, %31 : vector<8x128xi1>, vector<8x128xf32>
    %42 = tpu.iota {dimensions = array<i32: 0>} : vector<8x1xi32>
    %43 = vector.broadcast %0 : i32 to vector<8x1xi32>
    %44 = arith.addi %42, %43 : vector<8x1xi32>
    %c0_i32_12 = arith.constant 0 : i32
    %45 = vector.broadcast %c0_i32_12 : i32 to vector<8x1xi32>
    %46 = arith.addi %45, %44 : vector<8x1xi32>
    %c7_i32 = arith.constant 7 : i32
    %47 = vector.broadcast %c7_i32 : i32 to vector<8x1xi32>
    %48 = arith.minsi %47, %46 : vector<8x1xi32>
    %49 = tpu.iota {dimensions = array<i32: 1>} : vector<8x128xi32>
    %50 = vector.broadcast %48 : vector<8x1xi32> to vector<8x128xi32>
    %51 = arith.cmpi sle, %49, %50 : vector<8x128xi32>
    %52 = arith.addf %7, %41 : vector<8x128xf32>
    %cst_13 = arith.constant 0xFF800000 : f32
    %53 = vector.broadcast %cst_13 : f32 to vector<8x128xf32>
    %54 = arith.select %51, %52, %53 : vector<8x128xi1>, vector<8x128xf32>
    %cst_14 = arith.constant dense<0xFF800000> : vector<8xf32>
    %55 = vector.multi_reduction <maximumf>, %54, %cst_14 [1] : vector<8x128xf32> to vector<8xf32>
    %56 = vector.shape_cast %55 : vector<8xf32> to vector<8x1xf32>
    %57 = vector.broadcast %56 : vector<8x1xf32> to vector<8x128xf32>
    %58 = arith.subf %54, %57 : vector<8x128xf32>
    %59 = math.exp %58 : vector<8x128xf32>
    %cst_15 = arith.constant dense<0.000000e+00> : vector<8xf32>
    %60 = vector.multi_reduction <add>, %59, %cst_15 [1] : vector<8x128xf32> to vector<8xf32>
    %61 = vector.shape_cast %60 : vector<8xf32> to vector<8x1xf32>
    %c0_16 = arith.constant 0 : index
    %c0_17 = arith.constant 0 : index
    %c0_18 = arith.constant 0 : index
    %62 = vector.load %arg4[%c0_16, %c0_17, %c0_18] : memref<1x128x32xf32, #tpu.memory_space<vmem>>, vector<1x128x32xf32>
    %63 = vector.shape_cast %62 : vector<1x128x32xf32> to vector<128x32xf32>
    %cst_19 = arith.constant dense<0.000000e+00> : vector<8x32xf32>
    %64 = tpu.matmul %59, %63, %cst_19 {dimension_numbers = #tpu.dot_dimension_numbers<[1], [0], [0], [1], [0, 0, 1, 1], [], []>} : vector<8x128xf32>, vector<128x32xf32>, vector<8x32xf32> -> vector<8x32xf32>
    %65 = tpu.reciprocal %61 {approx = true} : vector<8x1xf32> -> vector<8x1xf32>
    %66 = vector.broadcast %65 : vector<8x1xf32> to vector<8x32xf32>
    %67 = arith.mulf %64, %66 : vector<8x32xf32>
    %c0_20 = arith.constant 0 : index
    %c0_21 = arith.constant 0 : index
    %c0_22 = arith.constant 0 : index
    %68 = vector.load %arg6[%c0_20, %c0_21, %c0_22] : memref<1x8x32xf32, #tpu.memory_space<vmem>>, vector<1x8x32xf32>
    %69 = vector.shape_cast %68 : vector<1x8x32xf32> to vector<8x32xf32>
    %70 = vector.shape_cast %67 : vector<8x32xf32> to vector<1x8x32xf32>
    tpu.vector_store %arg6[%c0_20, %c0_21, %c0_22], %70 {strides = array<i32>} : memref<1x8x32xf32, #tpu.memory_space<vmem>>, vector<1x8x32xf32>,
    return
  }
  func.func @transform_0(%arg0: i32, %arg1: i32) -> (i32, i32, i32) {
    %c0_i32 = arith.constant 0 : i32
    %c0_i32_0 = arith.constant 0 : i32
    return %arg0, %arg1, %c0_i32 : i32, i32, i32
  }
  func.func @transform_1(%arg0: i32, %arg1: i32) -> (i32, i32, i32) {
    %c0_i32 = arith.constant 0 : i32
    %c0_i32_0 = arith.constant 0 : i32
    %c0_i32_1 = arith.constant 0 : i32
    return %arg0, %c0_i32, %c0_i32_0 : i32, i32, i32
  }
  func.func @transform_2(%arg0: i32, %arg1: i32) -> (i32, i32, i32) {
    %c0_i32 = arith.constant 0 : i32
    %c0_i32_0 = arith.constant 0 : i32
    %c0_i32_1 = arith.constant 0 : i32
    return %arg0, %c0_i32, %c0_i32_0 : i32, i32, i32
  }
  func.func @transform_3(%arg0: i32, %arg1: i32) -> (i32, i32, i32) {
    %c0_i32 = arith.constant 0 : i32
    %c0_i32_0 = arith.constant 0 : i32
    %c0_i32_1 = arith.constant 0 : i32
    %c0_i32_2 = arith.constant 0 : i32
    return %c0_i32, %c0_i32_0, %c0_i32_1 : i32, i32, i32
  }
  func.func @transform_4(%arg0: i32, %arg1: i32) -> (i32, i32, i32) {
    %c0_i32 = arith.constant 0 : i32
    %c0_i32_0 = arith.constant 0 : i32
    return %arg0, %arg1, %c0_i32 : i32, i32, i32
  }
}

</mosaic_0001>

<bundles_post_ra>
// kernel: tpu_custom_call.1
= control target key start
LH: loop header
LB: loop body
LE: loop exit
PB: predicated region body
PF: predicated region fallthrough
CT: control target
= control target key end

     0   :  { %8 = vsyncpa [#allocation5], 0  ;;  %s295_s0 = inlined_call_operand.<no memory space> [shape: s32[1], index: 0, kind: input, shape index: {}]   ;;  %s296_s1 = inlined_call_operand.hbm [shape: f32[32,256], index: 1, kind: input, shape index: {}]   ;;  %s297_s2 = inlined_call_operand.hbm [shape: f32[32,256], index: 2, kind: output, shape index: {}]  }
   0x1   :  { %9 = vsyncpa [#allocation6], 0  ;;  %s203_s9 = smov [#allocation4]   ;;  %s155_s13 = scalar_lea.hbm %s296_s1, 1024 }
   0x2   :  { %s15_s10 = sshll.u32 %s203_s9, 4  ;;  %p156_p0 = scmp.ne.s32.totalorder %s296_s1, %s155_s13  ;;  %s16_s10 = int_to_ptr.vmem [resolvable:$true] %s15_s10 }
   0x3   :  { %p159_p1 = scmp.lt.u32.totalorder %s155_s13, %s296_s1 }
   0x5   :  { %p161_p2 = pnand %p159_p1, %p156_p0 }
   0x7   :  { %164 = shalt.err (!%p161_p2)
}
   0x8   :  { %s165_s18 = scalar_lea.vmem %s16_s10, 1024  ;;  %p170_p4 = scmp.lt.s32.totalorder %s16_s10, %s16_s10 }
   0x9   :  { %p166_p3 = scmp.ne.s32.totalorder %s16_s10, %s165_s18  ;;  %p171_p5 = scmp.lt.s32.totalorder %s165_s18, %s165_s18 }
   0xb   :  { %p172_p6 = por %p171_p5, %p170_p4 }
   0xd   :  { %p173_p7 = pnand %p172_p6, %p166_p3 }
   0xf   :  { %176 = shalt.err (!%p173_p7)
}
  0x10   :  { %s204_s19 = smov 256   ;;  %s205_s20 = smov 16  }
  0x11   :  { %21 = dma.hbm_to_vmem [thread:$0]  %s296_s1, 1024, %s16_s10, [#allocation5], %s204_s19, %s204_s19, %s205_s20  }
  0x12   :  { %199 = dma.done.wait [#allocation5], 1024  }
  0x13   :  { %200 = vsyncadd [#allocation5], 4294966272  ;;  %s34_s25 = sand.u32 255, %s295_s0   ;;  %v29_v0 = vld [vmem:[#allocation4 + $0x20] sm:$0xff]  ;;  %v31_v2 = vld [vmem:[#allocation4 + $0x30] sm:$0xff]  ;;  %v54_v8 = vlaneseq  ;;  %s206_s27 = smov 264  }
  0x14   :  { %s35_s26 = sand.u32 127, %s34_s25   ;;  %v25_v1 = vld [vmem:[#allocation4] sm:$0xff]  ;;  %v27_v3 = vld [vmem:[#allocation4 + $0x10] sm:$0xff]  ;;  %v28_v4 = vld [vmem:[#allocation4 + $0x18] sm:$0xff]  ;;  %s36_s1 = sshrl.u32 %s34_s25, 7 }
  0x15   :  { %41 = vrot.lane.b32.xlu1 %v29_v0, %s35_s26  ;;  %37 = vrot.lane.b32.xlu0 %v25_v1, %s35_s26  ;;  %v26_v5 = vld [vmem:[#allocation4 + $0x8] sm:$0xff]  ;;  %v32_v6 = vld [vmem:[#allocation4 + $0x38] sm:$0xff]  ;;  %s65_s0 = sand.u32 1, %s36_s1  ;;  %v243_v11 = vand.u32 127, %v54_v8  ;;  %v53_v12 = vstv %s35_s26  ;;  %s207_s28 = smov 272   ;;  %v83_v37 = vshrl.u32 %v54_v8, 7 }
  0x16   :  { %v30_v7 = vld [vmem:[#allocation4 + $0x28] sm:$0xff]  ;;  %v66_v15 = vstv %s65_s0  ;;  %s208_s29 = smov 280   ;;  %s209_s30 = smov [#allocation7]  }
  0x17   :  { %vm246_vm0 = vcmp.lt.s32.totalorder %v243_v11, %v53_v12  ;;  %vm67_vm1 = vcmp.ne.s32.totalorder %v66_v15, 0  ;;  %vm84_vm2 = vcmp.lt.s32.totalorder %v243_v11, %v83_v37  ;;  %v95_v38 = vadd.s32 8, %v83_v37  ;;  %s136_s3 = sshll.u32 %s209_s30, 4  ;;  %s137_s3 = int_to_ptr.vmem [resolvable:$true] %s136_s3 }
  0x18   :  { %v107_v43 = vadd.s32 16, %v83_v37  ;;  %v119_v48 = vadd.s32 24, %v83_v37  ;;  %s177_s4 = scalar_lea.vmem %s137_s3, 1024  ;;  %p182_p9 = scmp.lt.s32.totalorder %s137_s3, %s137_s3 }
  0x19   :  { %43 = vrot.lane.b32.xlu1 %v31_v2, %s35_s26  ;;  %39 = vrot.lane.b32.xlu0 %v27_v3, %s35_s26  ;;  %vm96_vm3 = vcmp.lt.s32.totalorder %v243_v11, %v95_v38  ;;  %p178_p8 = scmp.ne.s32.totalorder %s137_s3, %s177_s4  ;;  %p183_p10 = scmp.lt.s32.totalorder %s177_s4, %s177_s4 }
  0x1a   :  { %vm108_vm4 = vcmp.lt.s32.totalorder %v243_v11, %v107_v43  ;;  %vm120_vm5 = vcmp.lt.s32.totalorder %v243_v11, %v119_v48 }
  0x1b   :  { %p184_p11 = por %p183_p10, %p182_p9 }
  0x1d   :  { %47 = vrot.lane.b32.xlu1 %v28_v4, %s35_s26  ;;  %45 = vrot.lane.b32.xlu0 %v26_v5, %s35_s26  ;;  %p185_p12 = pnand %p184_p11, %p178_p8 }
  0x21   :  { %51 = vrot.lane.b32.xlu1 %v32_v6, %s35_s26  ;;  %49 = vrot.lane.b32.xlu0 %v30_v7, %s35_s26 }
  0x87   :  { %v42_v9 = vpop.permute.xlu1 %41  ;;  %v38_v10 = vpop.permute.xlu0 %37 }
  0x8b   :  { %v44_v13 = vpop.permute.xlu1 %43  ;;  %v40_v14 = vpop.permute.xlu0 %39 }
  0x8f   :  { %v48_v17 = vpop.permute.xlu1 %47  ;;  %v46_v18 = vpop.permute.xlu0 %45 }
  0x90   :  { %v58_v19 = vsel %vm246_vm0, %v40_v14, %v48_v17  ;;  %v62_v20 = vsel %vm246_vm0, %v48_v17, %v40_v14  ;;  %v57_v21 = vsel %vm246_vm0, %v38_v10, %v46_v18  ;;  %v61_v22 = vsel %vm246_vm0, %v46_v18, %v38_v10 }
  0x91   :  { %v69_v23 = vsel %vm67_vm1, %v61_v22, %v57_v21  ;;  %v68_v24 = vsel %vm67_vm1, %v57_v21, %v61_v22  ;;  %v71_v25 = vsel %vm67_vm1, %v62_v20, %v58_v19  ;;  %v70_v26 = vsel %vm67_vm1, %v58_v19, %v62_v20 }
  0x92   :  { %80 = vrot.lane.b32.xlu1 %v69_v23, %s204_s19  ;;  %77 = vrot.lane.b32.xlu0 %v68_v24, %s204_s19 }
  0x93   :  { %v52_v27 = vpop.permute.xlu1 %51  ;;  %v50_v28 = vpop.permute.xlu0 %49 }
  0x94   :  { %v60_v29 = vsel %vm246_vm0, %v44_v13, %v52_v27  ;;  %v64_v30 = vsel %vm246_vm0, %v52_v27, %v44_v13  ;;  %v59_v31 = vsel %vm246_vm0, %v42_v9, %v50_v28  ;;  %v63_v32 = vsel %vm246_vm0, %v50_v28, %v42_v9 }
  0x95   :  { %v73_v33 = vsel %vm67_vm1, %v63_v32, %v59_v31  ;;  %v72_v34 = vsel %vm67_vm1, %v59_v31, %v63_v32  ;;  %v75_v35 = vsel %vm67_vm1, %v64_v30, %v60_v29  ;;  %v74_v36 = vsel %vm67_vm1, %v60_v29, %v64_v30 }
  0x96   :  { %93 = vrot.lane.b32.xlu1 %v71_v25, %s206_s27  ;;  %89 = vrot.lane.b32.xlu0 %v70_v26, %s206_s27 }
  0x9a   :  { %105 = vrot.lane.b32.xlu1 %v73_v33, %s207_s28  ;;  %101 = vrot.lane.b32.xlu0 %v72_v34, %s207_s28 }
  0x9e   :  { %117 = vrot.lane.b32.xlu1 %v75_v35, %s208_s29  ;;  %113 = vrot.lane.b32.xlu0 %v74_v36, %s208_s29 }
 0x104   :  { %v81_v39 = vpop.permute.xlu1 %80  ;;  %v78_v40 = vpop.permute.xlu0 %77 }
 0x105   :  { %v85_v41 = vsel %vm84_vm2, %v78_v40, %v81_v39  ;;  %v86_v42 = vsel %vm84_vm2, %v81_v39, %v78_v40 }
 0x106   :  { %123 = vst [vmem:[#allocation7] sm:$0xff] %v86_v42  ;;  %124 = vst [vmem:[#allocation7 + $0x8] sm:$0xff] %v85_v41 }
 0x108   :  { %v94_v44 = vpop.permute.xlu1 %93  ;;  %v90_v45 = vpop.permute.xlu0 %89 }
 0x109   :  { %v97_v46 = vsel %vm96_vm3, %v90_v45, %v94_v44  ;;  %v98_v47 = vsel %vm96_vm3, %v94_v44, %v90_v45 }
 0x10a   :  { %125 = vst [vmem:[#allocation7 + $0x10] sm:$0xff] %v98_v47  ;;  %126 = vst [vmem:[#allocation7 + $0x18] sm:$0xff] %v97_v46 }
 0x10c   :  { %v106_v49 = vpop.permute.xlu1 %105  ;;  %v102_v50 = vpop.permute.xlu0 %101 }
 0x10d   :  { %v109_v51 = vsel %vm108_vm4, %v102_v50, %v106_v49  ;;  %v110_v52 = vsel %vm108_vm4, %v106_v49, %v102_v50 }
 0x10e   :  { %127 = vst [vmem:[#allocation7 + $0x20] sm:$0xff] %v110_v52  ;;  %128 = vst [vmem:[#allocation7 + $0x28] sm:$0xff] %v109_v51 }
 0x110   :  { %v118_v53 = vpop.permute.xlu1 %117  ;;  %v114_v54 = vpop.permute.xlu0 %113 }
 0x111   :  { %v121_v55 = vsel %vm120_vm5, %v114_v54, %v118_v53  ;;  %v122_v56 = vsel %vm120_vm5, %v118_v53, %v114_v54 }
 0x112   :  { %129 = vst [vmem:[#allocation7 + $0x30] sm:$0xff] %v122_v56  ;;  %130 = vst [vmem:[#allocation7 + $0x38] sm:$0xff] %v121_v55 }
 0x113   :  { %188 = shalt.err (!%p185_p12)
}
 0x114   :  { %s189_s7 = scalar_lea.hbm %s297_s2, 1024 }
 0x115   :  { %p190_p13 = scmp.ne.s32.totalorder %s297_s2, %s189_s7  ;;  %p193_p0 = scmp.lt.u32.totalorder %s189_s7, %s297_s2 }
 0x117   :  { %p195_p1 = pnand %p193_p0, %p190_p13 }
 0x119   :  { %198 = shalt.err (!%p195_p1)
}
 0x11a   :  { %142 = dma.vmem_to_hbm [thread:$0]  %s137_s3, 1024, %s297_s2, [#allocation6], %s204_s19, %s204_s19, %s205_s20  }
 0x11b   :  { %201 = dma.done.wait [#allocation6], 1024  }
 0x11c   :  { %202 = vsyncadd [#allocation6], 4294966272 }
 0x11d   :  { %146 = vsyncpa [#allocation5], 1 }
 0x11e   :  { %147 = vsyncpa [#allocation6], 1 }

// kernel: tpu_custom_call.1
= control target key start
LH: loop header
LB: loop body
LE: loop exit
PB: predicated region body
PF: predicated region fallthrough
CT: control target
= control target key end

     0   :  { %9 = vsyncpa [#allocation3], 0  ;;  %s1330_s0 = inlined_call_operand.vmem [shape: f32[2,8,32], index: 0, kind: input, shape index: {}]   ;;  %s1331_s1 = inlined_call_operand.vmem [shape: f32[2,128,32], index: 1, kind: input, shape index: {}]   ;;  %s1332_s2 = inlined_call_operand.vmem [shape: f32[2,128,32], index: 2, kind: input, shape index: {}]   ;;  %s1333_s3 = inlined_call_operand.vmem [shape: f32[1,32,128], index: 3, kind: input, shape index: {}]   ;;  %s1334_s4 = inlined_call_operand.hbm [shape: f32[2,8,32], index: 4, kind: output, shape index: {}]  }
   0x1   :  { %11 = vsyncpa [#allocation3 + $0x1], 0  ;;  %s1110_s15 = smov 0   ;;  %s1112_s16 = smov 0  }
   0x2   :  { %s1114_s17 = smov 0   ;;  %s1116_s18 = smov 0  }
   0x3   :  { %s1118_s19 = smov 0   ;;  %s1120_s20 = smov 0  }
   0x4 LB: > { %s716_s21 = sadd.s32 4294967295, %s1076_s20   ;;  %s717_s22 = sadd.s32 4294967294, %s1076_s20   ;;  %s1076_s20 = sphi %s1120_s20, %s17_s20   ;;  %s1072_s19 = sphi %s1118_s19, %s1343_s19   ;;  %s1068_s18 = sphi %s1116_s18, %s1342_s18   ;;  %s1064_s17 = sphi %s1114_s17, %s1341_s17   ;;  %s1060_s16 = sphi %s1112_s16, %s1340_s16   ;;  %s1056_s15 = sphi %s1110_s15, %s1339_s15  }
   0x5   : > { %s29_s23 = sadd.s32 1, %s1072_s19  ;;  %s139_s24 = sadd.s32 1, %s1064_s17 }
   0x6   : > { %p31_p0 = scmp.ge.s32.totalorder %s29_s23, 2  ;;  %p149_p1 = scmp.ne.s32.totalorder %s1064_s17, %s1060_s16 }
   0x7   : > { %p150_p2 = scmp.eq.s32.totalorder %s716_s21, 1  ;;  %p155_p3 = scmp.ne.s32.totalorder %s1060_s16, %s1056_s15 }
   0x8   : > { %s1345_s23 = smov (%p31_p0, %s29_s23), 0  ;;  %p156_p5 = scmp.eq.s32.totalorder %s717_s22, 1 }
   0x9   : > { %p1150_p4 = por %p150_p2, %p149_p1  ;;  %s134_s26 = ssub.s32 %s1072_s19, %s1345_s23 }
   0xa   : > { %p720_p6 = scmp.ge.s32.totalorder %s1076_s20, 1  ;;  %p137_p7 = scmp.eq.s32.totalorder %s134_s26, 0 }
   0xb   : > { %p1157_p8 = por %p156_p5, %p155_p3  ;;  %p203_p9 = scmp.lt.s32.totalorder %s1076_s20, 3 }
   0xc   : > { %s1163_s28 = scalar_select %p137_p7, %s1064_s17, %s139_s24  }
   0xd   : > { %p204_p10 = pnand %p720_p6, %p203_p9 }
   0xe   : > { %v277_v0 = vld [vmem:[%s1333_s3] sm:$0xff] (!%p204_p10)  ;;  %v278_v1 = vld [vmem:[%s1333_s3 + $0x8] sm:$0xff] (!%p204_p10)  ;;  %v279_v2 = vld [vmem:[%s1333_s3 + $0x10] sm:$0xff] (!%p204_p10)  ;;  %v1078_v3 = vmov (!%p204_p10), 0.0|0.0   ;;  %vm1079_vm0 = vmmov (!%p204_p10), 0   ;;  %v1080_v6 = vmov (!%p204_p10), 0.0   ;;  %v355_v37 = vlaneseq (!%p204_p10) }
   0xf   : > { %207 = sbr.rel (%p204_p10) target bundleno = 977 (0x3d1), region = 36  ;;  %871 = vmatprep.subr.bf16.mxu0 (!%p204_p10), %v1078_v3  ;;  %v872_v4 = vpack.c.bf16 (!%p204_p10), %v278_v1, %v277_v0  ;;  %v280_v5 = vld [vmem:[%s1333_s3 + $0x18] sm:$0xff] (!%p204_p10)  ;;  %798 = vmatprep.mubr.msk.f32.mxu0 (!%p204_p10), %vm1079_vm0, %v1080_v6  ;;  %p241_p11 = scmp.lt.s32.totalorder (!%p204_p10), %s1068_s18, 1  ;;  %vm281_vm1 = vcmask (!%p204_p10), 261120  }
  0x10   : > { %877 = vmatprep.subr.bf16.mxu1 (!%p204_p10), %v1078_v3  ;;  %833 = vmatprep.mubr.msk.f32.mxu1 (!%p204_p10), %vm1079_vm0, %v1080_v6  ;;  %v875_v7 = vpack.c.bf16 (!%p204_p10), %v280_v5, %v279_v2  ;;  %vm1203_vm2 = vmpackc.low (!%p204_p10), %vm281_vm1, %vm281_vm1  ;;  %s1081_s30 = smov (!%p204_p10), 1   ;;  %v356_v38 = vshrl.u32 (!%p204_p10), %v355_v37, 7  ;;  %s1082_s5 = smov (!%p204_p10), 2   ;;  %v389_v60 = vand.u32 (!%p204_p10), 127, %v355_v37 }
  0x11   : > { %873 = vmatpush3.bf16.msra.mxu0 (!%p204_p10), %v872_v4  ;;  %s1083_s9 = smov (!%p204_p10), 4   ;;  %s238_s10 = sand.u32 (!%p204_p10), 1, %s1060_s16  }
  0x12   : > { %874 = vmatprep.subr.bf16.mxu0 (!%p204_p10), %v1078_v3  ;;  %v361_v39 = vand.u32 (!%p204_p10), 1, %v356_v38  ;;  %v370_v47 = vand.u32 (!%p204_p10), 2, %v356_v38  ;;  %v379_v59 = vand.u32 (!%p204_p10), 4, %v356_v38  ;;  %vm386_vm5 = vcmp.lt.s32.totalorder (!%p204_p10), %v356_v38, 7  ;;  %s607_s26 = scalar_lea.sflag (!%p204_p10), [#allocation3], %s238_s10 }
  0x13   : > { %v387_v61 = vsel (!%p204_p10), %vm386_vm5, %v356_v38, 7 }
  0x14   : > { %vm362_vm3 = vcmp.ne.s32.totalorder (!%p204_p10), %v361_v39, 0  ;;  %vm371_vm4 = vcmp.ne.s32.totalorder (!%p204_p10), %v370_v47, 0  ;;  %vm380_vm6 = vcmp.ne.s32.totalorder (!%p204_p10), %v379_v59, 0  ;;  %vm390_vm7 = vcmp.le.s32.totalorder (!%p204_p10), %v389_v60, %v387_v61 }
  0x15   : > { %876 = vmatpush3.bf16.msra.mxu0 (!%p204_p10), %v875_v7 }
  0x16   : > { %s1183_s11 = scalar_select %p241_p11, %s1068_s18, 1  ;;  %909 = vmatprep.subr.bf16.mxu0 %v1078_v3 }
  0x18   : > { %s722_s12 = sshll.u32 %s1183_s11, 3  ;;  %s749_s22 = sshll.u32 %s1183_s11, 7 }
  0x19   : > { %s247_s21 = scalar_lea.vmem %s1330_s0, %s722_s12  ;;  %s1199_s29 = scalar_lea.vmem %s1331_s1, %s749_s22 }
  0x1a   : > { %v259_v8 = vld [vmem:[%s247_s21] sm:$0xff]  ;;  %v262_v12 = vld [vmem:[%s1199_s29 + $0x8] sm:$0xff]  ;;  %v263_v14 = vld [vmem:[%s1199_s29 + $0x10] sm:$0xff]  ;;  %s1252_s8 = scalar_lea.vmem %s1332_s2, %s749_s22  ;;  %s721_s11 = sshll.u32 %s238_s10, 3 }
  0x1b   : > { %v260_v9 = vmul.f32 0.17677669, %v259_v8  ;;  %v261_v11 = vld [vmem:[%s1199_s29] sm:$0xff]  ;;  %v264_v15 = vld [vmem:[%s1199_s29 + $0x18] sm:$0xff]  ;;  %v266_v18 = vld [vmem:[%s1199_s29 + $0x28] sm:$0xff]  ;;  %s746_s12 = sshll.u32 %s1068_s18, 7 }
  0x1c   : > { %v878_v13 = vpack.c.bf16 %v262_v12, %v261_v11  ;;  %v882_v16 = vpack.c.bf16 %v264_v15, %v263_v14  ;;  %v265_v17 = vld [vmem:[%s1199_s29 + $0x20] sm:$0xff]  ;;  %v267_v20 = vld [vmem:[%s1199_s29 + $0x30] sm:$0xff]  ;;  %v268_v21 = vld [vmem:[%s1199_s29 + $0x38] sm:$0xff]  ;;  %s240_s13 = scalar_lea.vmem [#allocation2], %s721_s11  ;;  %s1282_s24 = scalar_lea.hbm %s1334_s4, %s746_s12 }
  0x1d   : > { %799 = vmatmul.mubr.msk.f32.vlgmr.msra.gmra.mrb[0].mxu0 %vm281_vm1, %v260_v9  ;;  %v886_v19 = vpack.c.bf16 %v266_v18, %v265_v17  ;;  %v890_v22 = vpack.c.bf16 %v268_v21, %v267_v20  ;;  %v269_v23 = vld [vmem:[%s1199_s29 + $0x40] sm:$0xff]  ;;  %v270_v24 = vld [vmem:[%s1199_s29 + $0x48] sm:$0xff]  ;;  %v271_v26 = vld [vmem:[%s1199_s29 + $0x50] sm:$0xff]  ;;  %s621_s14 = sshll.u32 %s240_s13, 4  ;;  %s1284_s14 = int_to_ptr.vmem [resolvable:$true] %s621_s14 }
  0x1e   : > { %868 = vmatprep.mubr.msk.f32.mxu0 %vm1079_vm0, %v1080_v6  ;;  %880 = vmatpush3.bf16.xpose.msk.msra.mxu1 %vm1203_vm2, %v878_v13  ;;  %v894_v25 = vpack.c.bf16 %v270_v24, %v269_v23  ;;  %v272_v27 = vld [vmem:[%s1199_s29 + $0x58] sm:$0xff]  ;;  %v273_v29 = vld [vmem:[%s1199_s29 + $0x60] sm:$0xff]  ;;  %v274_v30 = vld [vmem:[%s1199_s29 + $0x68] sm:$0xff]  ;;  %s998_s18 = scalar_lea.vmem %s1284_s14, 128 }
  0x1f   : > { %881 = vmatprep.subr.bf16.mxu1 %v1078_v3  ;;  %v898_v28 = vpack.c.bf16 %v272_v27, %v271_v26  ;;  %v902_v31 = vpack.c.bf16 %v274_v30, %v273_v29  ;;  %v275_v32 = vld [vmem:[%s1199_s29 + $0x70] sm:$0xff]  ;;  %v276_v33 = vld [vmem:[%s1199_s29 + $0x78] sm:$0xff]  ;;  %v517_v44 = vld [vmem:[%s1252_s8] sm:$0xff]  ;;  %p999_p12 = scmp.ne.s32.totalorder %s1284_s14, %s998_s18  ;;  %s1084_s29 = smov [#allocation2]  }
  0x20   : > { %v906_v34 = vpack.c.bf16 %v276_v33, %v275_v32  ;;  %v518_v45 = vld [vmem:[%s1252_s8 + $0x8] sm:$0xff]  ;;  %v519_v46 = vld [vmem:[%s1252_s8 + $0x10] sm:$0xff]  ;;  %v520_v49 = vld [vmem:[%s1252_s8 + $0x18] sm:$0xff] }
  0x21   : > { %v910_v48 = vpack.c.bf16 %v518_v45, %v517_v44  ;;  %v913_v50 = vpack.c.bf16 %v520_v49, %v519_v46  ;;  %v521_v51 = vld [vmem:[%s1252_s8 + $0x20] sm:$0xff]  ;;  %v522_v52 = vld [vmem:[%s1252_s8 + $0x28] sm:$0xff]  ;;  %v523_v56 = vld [vmem:[%s1252_s8 + $0x30] sm:$0xff]  ;;  %p1000_p13 = pnand %p999_p12, %p1150_p4 }
  0x22   : > { %v916_v54 = vpack.c.bf16 %v522_v52, %v521_v51  ;;  %v524_v57 = vld [vmem:[%s1252_s8 + $0x38] sm:$0xff]  ;;  %v525_v2 = vld [vmem:[%s1252_s8 + $0x40] sm:$0xff]  ;;  %v526_v4 = vld [vmem:[%s1252_s8 + $0x48] sm:$0xff] }
  0x23   : > { %911 = vmatpush3.bf16.msra.mxu0 %v910_v48  ;;  %v919_v58 = vpack.c.bf16 %v524_v57, %v523_v56  ;;  %v922_v5 = vpack.c.bf16 %v526_v4, %v525_v2  ;;  %v527_v6 = vld [vmem:[%s1252_s8 + $0x50] sm:$0xff]  ;;  %v528_v7 = vld [vmem:[%s1252_s8 + $0x58] sm:$0xff]  ;;  %v530_v10 = vld [vmem:[%s1252_s8 + $0x68] sm:$0xff]  ;;  %p1001_p0 = pneg %p1000_p13 }
  0x24   : > { %912 = vmatprep.subr.bf16.mxu0 %v1078_v3  ;;  %v925_v8 = vpack.c.bf16 %v528_v7, %v527_v6  ;;  %v531_v12 = vld [vmem:[%s1252_s8 + $0x70] sm:$0xff]  ;;  %v532_v13 = vld [vmem:[%s1252_s8 + $0x78] sm:$0xff] }
  0x25   : > { %v931_v14 = vpack.c.bf16 %v532_v13, %v531_v12 }
  0x26   : > { %884 = vmatpush3.bf16.xpose.msk.msra.mxu1 %vm1203_vm2, %v882_v16 }
  0x27   : > { %885 = vmatprep.subr.bf16.mxu1 %v1078_v3  ;;  %914 = vmatpush3.bf16.msra.mxu0 %v913_v50 }
  0x28   : > { %915 = vmatprep.subr.bf16.mxu0 %v1078_v3 }
  0x2b   : > { %917 = vmatpush3.bf16.msra.mxu0 %v916_v54 }
  0x2c   : > { %918 = vmatprep.subr.bf16.mxu0 %v1078_v3 }
  0x2e   : > { %888 = vmatpush3.bf16.xpose.msk.msra.mxu1 %vm1203_vm2, %v886_v19 }
  0x2f   : > { %889 = vmatprep.subr.bf16.mxu1 %v1078_v3  ;;  %920 = vmatpush3.bf16.msra.mxu0 %v919_v58 }
  0x30   : > { %921 = vmatprep.subr.bf16.mxu0 %v1078_v3 }
  0x33   : > { %923 = vmatpush3.bf16.msra.mxu0 %v922_v5 }
  0x34   : > { %924 = vmatprep.subr.bf16.mxu0 %v1078_v3 }
  0x36   : > { %892 = vmatpush3.bf16.xpose.msk.msra.mxu1 %vm1203_vm2, %v890_v22 }
  0x37   : > { %893 = vmatprep.subr.bf16.mxu1 %v1078_v3  ;;  %926 = vmatpush3.bf16.msra.mxu0 %v925_v8 }
  0x38   : > { %927 = vmatprep.subr.bf16.mxu0 %v1078_v3 }
  0x3e   : > { %896 = vmatpush3.bf16.xpose.msk.msra.mxu1 %vm1203_vm2, %v894_v25 }
  0x3f   : > { %897 = vmatprep.subr.bf16.mxu1 %v1078_v3 }
  0x46   : > { %900 = vmatpush3.bf16.xpose.msk.msra.mxu1 %vm1203_vm2, %v898_v28 }
  0x47   : > { %901 = vmatprep.subr.bf16.mxu1 %v1078_v3 }
  0x4e   : > { %904 = vmatpush3.bf16.xpose.msk.msra.mxu1 %vm1203_vm2, %v902_v31 }
  0x4f   : > { %905 = vmatprep.subr.bf16.mxu1 %v1078_v3 }
  0x56   : > { %908 = vmatpush3.bf16.xpose.msk.msra.mxu1 %vm1203_vm2, %v906_v34 }
  0x5d   : > { %834 = vmatmul.mubr.msk.f32.vlgmr.msra.gmra.mrb[0].mxu1 %vm281_vm1, %v260_v9  ;;  %v529_v9 = vld [vmem:[%s1252_s8 + $0x60] sm:$0xff] }
  0x5e   : > { %v928_v11 = vpack.c.bf16 %v530_v10, %v529_v9 }
  0x60   : > { %929 = vmatpush3.bf16.msra.mxu0 %v928_v11 }
  0x61   : > { %930 = vmatprep.subr.bf16.mxu0 %v1078_v3 }
  0x64   : > { %932 = vmatpush3.bf16.msra.mxu0 %v931_v14 }
  0xf0   : > { %v351_v35 = vpop.f32.mrb[0].mxu0 }
  0xf1   : > { %358 = vrot.lane.b32.xlu0 %v351_v35, %s1081_s30  ;;  %v800_v36 = vpop.f32.mrb[1].mxu0  ;;  %s1002_s30 = sshll.u32 %s1084_s29, 4  ;;  %s1003_s30 = int_to_ptr.vmem [resolvable:$false] %s1002_s30 }
  0xf2   : > { %p1005_p1 = scmp.lt.s32.totalorder %s1284_s14, %s1003_s30 }
 0x130   : > { %v505_v42 = vpop.f32.mrb[0].mxu1 }
 0x131   : > { %v835_v43 = vpop.f32.mrb[1].mxu1 }
 0x163   : > { %v359_v40 = vpop.permute.xlu0 %358 }
 0x164   : > { %v365_v41 = vsel %vm362_vm3, %v359_v40, %v351_v35 }
 0x165   : > { %367 = vrot.lane.b32.xlu0 %v365_v41, %s1082_s5  ;;  %s1004_s5 = scalar_lea.vmem %s1003_s30, 256 }
 0x166   : > { %p1006_p2 = scmp.lt.s32.totalorder %s1004_s5, %s998_s18 }
 0x168   : > { %p1007_p3 = por %p1006_p2, %p1005_p1 }
 0x16a   : > { %p1008_p5 = pnand %p1007_p3, %p1001_p0 }
 0x1d7   : > { %v368_v53 = vpop.permute.xlu0 %367 }
 0x1d8   : > { %v374_v55 = vsel %vm371_vm4, %v368_v53, %v365_v41 }
 0x1d9   : > { %376 = vrot.lane.b32.xlu1 %v374_v55, %s1083_s9 }
 0x24b   : > { %v377_v62 = vpop.permute.xlu1 %376 }
 0x24c   : > { %v383_v63 = vsel %vm380_vm6, %v377_v62, %v374_v55 }
 0x24d   : > { %v506_v0 = vadd.f32 %v505_v42, %v383_v63 }
 0x24f   : > { %v509_v1 = vsel %vm390_vm7, %v506_v0, -inf }
 0x250   : > { %510 = vmax.xlane.f32.xlu1 %v509_v1 }
 0x2dd   : > { %v511_v15 = vpop.xlane.xlu1 %510 }
 0x2de   : > { %v512_v16 = vsub.f32 %v509_v1, %v511_v15 }
 0x2e0   : > { %v513_v17 = vmul.f32 1.442695, %v512_v16 }
 0x2e2   : > { %994 = vpow2.f32 %v513_v17 }
 0x2ec   : > { %v995_v18 = vpop.eup %994 }
 0x2ed   : > { %515 = vadd.xlane.f32.xlu0 %v995_v18  ;;  %869 = vmatmul.mubr.f32.vlgmr.msra.gmra.mrb[2].mxu0 %v995_v18 }
 0x37a   : > { %v516_v19 = vpop.xlane.xlu0 %515 }
 0x37b   : > { %996 = vrcp.f32 %v516_v19 }
 0x385   : > { %v997_v20 = vpop.eup %996 }
 0x3c0   : > { %v599_v21 = vpop.f32.mrb[2].mxu0 }
 0x3c1   : > { %v604_v22 = vmul.f32 %v997_v20, %v599_v21  ;;  %v870_v3 = vpop.f32.mrb[3].mxu0 }
 0x3c3   : > { %605 = vst.msk [vmem:[%s240_s13] sm:$0xff] %vm281_vm1, %v604_v22 }
 0x3c4   : > { %1011 = shalt.err (!%p1008_p5)
}
 0x3c5   : > { %s1012_s6 = scalar_lea.hbm %s1282_s24, 128  ;;  %s1016_s9 = scalar_lea.hbm %s1334_s4, 256 }
 0x3c6   : > { %p1013_p6 = scmp.ne.s32.totalorder %s1282_s24, %s1012_s6  ;;  %p1017_p10 = scmp.lt.u32.totalorder %s1282_s24, %s1334_s4 }
 0x3c7   : > { %p1018_p11 = scmp.lt.u32.totalorder %s1016_s9, %s1012_s6  ;;  %p1020_p13 = scmp.lt.u32.totalorder %s1012_s6, %s1282_s24 }
 0x3c8   : > { %p1014_p7 = pnand %p1013_p6, %p1150_p4 }
 0x3c9   : > { %p1019_p12 = por %p1018_p11, %p1017_p10 }
 0x3ca   : > { %p1015_p9 = pneg %p1014_p7 }
 0x3cb   : > { %p1021_p0 = por %p1020_p13, %p1019_p12 }
 0x3cd   : > { %p1022_p1 = pnand %p1021_p0, %p1015_p9 }
 0x3cf   : > { %1025 = shalt.err (!%p1022_p1)
}
 0x3d0   : > { %933 = dma.vmem_to_hbm [thread:$0]  (%p1150_p4), %s1284_s14, 128, %s1282_s24, %s607_s26  }
 0x3d1 PF: > { %p939_p2 = scmp.ge.s32.totalorder %s1076_s20, 2  ;;  %s633_s12 = sand.u32 1, %s1056_s15  }
 0x3d2   : > { %s634_s13 = scalar_lea.sflag [#allocation3], %s633_s12 }
 0x3d3   : > { %p936_p3 = pnand %p939_p2, %p1157_p8 }
 0x3d5   : > { %1051 = dma.done.wait (!%p936_p3), %s634_s13, 128  }
 0x3d6   : > { %1053 = vsyncadd (!%p936_p3), %s634_s13, 4294967168  ;;  %s17_s20 = sadd.s32 1, %s1076_s20   ;;  %s1339_s15 = smov %s1060_s16 }
 0x3d7   : > { %p14_p5 = scmp.ge.s32.totalorder %s17_s20, 4   ;;  %s1340_s16 = smov %s1064_s17 }
 0x3d8   : > { %s1341_s17 = smov %s1163_s28  ;;  %s1342_s18 = smov %s1072_s19 }
 0x3d9   : > { %s1343_s19 = smov %s1345_s23  ;;  %16 = sbr.rel (!%p14_p5) target bundleno = 4 (0x4), region = 77 }
 0x3e0   :  { %639 = vsyncpa [#allocation3], 1 }
 0x3e1   :  { %641 = vsyncpa [#allocation3 + $0x1], 1 }

// kernel: tpu_custom_call.1
= control target key start
LH: loop header
LB: loop body
LE: loop exit
PB: predicated region body
PF: predicated region fallthrough
CT: control target
= control target key end

     0   :  { %9 = vsyncpa [#allocation3], 0  ;;  %s1330_s0 = inlined_call_operand.vmem [shape: f32[2,8,32], index: 0, kind: input, shape index: {}]   ;;  %s1331_s1 = inlined_call_operand.vmem [shape: f32[2,128,32], index: 1, kind: input, shape index: {}]   ;;  %s1332_s2 = inlined_call_operand.vmem [shape: f32[2,128,32], index: 2, kind: input, shape index: {}]   ;;  %s1333_s3 = inlined_call_operand.vmem [shape: f32[1,32,128], index: 3, kind: input, shape index: {}]   ;;  %s1334_s4 = inlined_call_operand.hbm [shape: f32[2,8,32], index: 4, kind: output, shape index: {}]  }
   0x1   :  { %11 = vsyncpa [#allocation3 + $0x1], 0  ;;  %s1110_s15 = smov 0   ;;  %s1112_s16 = smov 0  }
   0x2   :  { %s1114_s17 = smov 0   ;;  %s1116_s18 = smov 0  }
   0x3   :  { %s1118_s19 = smov 0   ;;  %s1120_s20 = smov 0  }
   0x4 LB: > { %s716_s21 = sadd.s32 4294967295, %s1076_s20   ;;  %s717_s22 = sadd.s32 4294967294, %s1076_s20   ;;  %s1076_s20 = sphi %s1120_s20, %s17_s20   ;;  %s1072_s19 = sphi %s1118_s19, %s1343_s19   ;;  %s1068_s18 = sphi %s1116_s18, %s1342_s18   ;;  %s1064_s17 = sphi %s1114_s17, %s1341_s17   ;;  %s1060_s16 = sphi %s1112_s16, %s1340_s16   ;;  %s1056_s15 = sphi %s1110_s15, %s1339_s15  }
   0x5   : > { %s29_s23 = sadd.s32 1, %s1072_s19  ;;  %s139_s24 = sadd.s32 1, %s1064_s17 }
   0x6   : > { %p31_p0 = scmp.ge.s32.totalorder %s29_s23, 2  ;;  %p149_p1 = scmp.ne.s32.totalorder %s1064_s17, %s1060_s16 }
   0x7   : > { %p150_p2 = scmp.eq.s32.totalorder %s716_s21, 1  ;;  %p155_p3 = scmp.ne.s32.totalorder %s1060_s16, %s1056_s15 }
   0x8   : > { %s1345_s23 = smov (%p31_p0, %s29_s23), 0  ;;  %p156_p5 = scmp.eq.s32.totalorder %s717_s22, 1 }
   0x9   : > { %p1150_p4 = por %p150_p2, %p149_p1  ;;  %s134_s26 = ssub.s32 %s1072_s19, %s1345_s23 }
   0xa   : > { %p720_p6 = scmp.ge.s32.totalorder %s1076_s20, 1  ;;  %p137_p7 = scmp.eq.s32.totalorder %s134_s26, 0 }
   0xb   : > { %p1157_p8 = por %p156_p5, %p155_p3  ;;  %p203_p9 = scmp.lt.s32.totalorder %s1076_s20, 3 }
   0xc   : > { %s1163_s28 = scalar_select %p137_p7, %s1064_s17, %s139_s24  }
   0xd   : > { %p204_p10 = pnand %p720_p6, %p203_p9 }
   0xe   : > { %v277_v0 = vld [vmem:[%s1333_s3] sm:$0xff] (!%p204_p10)  ;;  %v278_v1 = vld [vmem:[%s1333_s3 + $0x8] sm:$0xff] (!%p204_p10)  ;;  %v279_v2 = vld [vmem:[%s1333_s3 + $0x10] sm:$0xff] (!%p204_p10)  ;;  %v1078_v3 = vmov (!%p204_p10), 0.0|0.0   ;;  %vm1079_vm0 = vmmov (!%p204_p10), 0   ;;  %v1080_v6 = vmov (!%p204_p10), 0.0   ;;  %v355_v37 = vlaneseq (!%p204_p10) }
   0xf   : > { %207 = sbr.rel (%p204_p10) target bundleno = 977 (0x3d1), region = 36  ;;  %871 = vmatprep.subr.bf16.mxu0 (!%p204_p10), %v1078_v3  ;;  %v872_v4 = vpack.c.bf16 (!%p204_p10), %v278_v1, %v277_v0  ;;  %v280_v5 = vld [vmem:[%s1333_s3 + $0x18] sm:$0xff] (!%p204_p10)  ;;  %798 = vmatprep.mubr.msk.f32.mxu0 (!%p204_p10), %vm1079_vm0, %v1080_v6  ;;  %p241_p11 = scmp.lt.s32.totalorder (!%p204_p10), %s1068_s18, 1  ;;  %vm281_vm1 = vcmask (!%p204_p10), 261120  }
  0x10   : > { %877 = vmatprep.subr.bf16.mxu1 (!%p204_p10), %v1078_v3  ;;  %833 = vmatprep.mubr.msk.f32.mxu1 (!%p204_p10), %vm1079_vm0, %v1080_v6  ;;  %v875_v7 = vpack.c.bf16 (!%p204_p10), %v280_v5, %v279_v2  ;;  %vm1203_vm2 = vmpackc.low (!%p204_p10), %vm281_vm1, %vm281_vm1  ;;  %s1081_s30 = smov (!%p204_p10), 1   ;;  %v356_v38 = vshrl.u32 (!%p204_p10), %v355_v37, 7  ;;  %s1082_s5 = smov (!%p204_p10), 2   ;;  %v389_v60 = vand.u32 (!%p204_p10), 127, %v355_v37 }
  0x11   : > { %873 = vmatpush3.bf16.msra.mxu0 (!%p204_p10), %v872_v4  ;;  %s1083_s9 = smov (!%p204_p10), 4   ;;  %s238_s10 = sand.u32 (!%p204_p10), 1, %s1060_s16  }
  0x12   : > { %874 = vmatprep.subr.bf16.mxu0 (!%p204_p10), %v1078_v3  ;;  %v361_v39 = vand.u32 (!%p204_p10), 1, %v356_v38  ;;  %v370_v47 = vand.u32 (!%p204_p10), 2, %v356_v38  ;;  %v379_v59 = vand.u32 (!%p204_p10), 4, %v356_v38  ;;  %vm386_vm5 = vcmp.lt.s32.totalorder (!%p204_p10), %v356_v38, 7  ;;  %s607_s26 = scalar_lea.sflag (!%p204_p10), [#allocation3], %s238_s10 }
  0x13   : > { %v387_v61 = vsel (!%p204_p10), %vm386_vm5, %v356_v38, 7 }
  0x14   : > { %vm362_vm3 = vcmp.ne.s32.totalorder (!%p204_p10), %v361_v39, 0  ;;  %vm371_vm4 = vcmp.ne.s32.totalorder (!%p204_p10), %v370_v47, 0  ;;  %vm380_vm6 = vcmp.ne.s32.totalorder (!%p204_p10), %v379_v59, 0  ;;  %vm390_vm7 = vcmp.le.s32.totalorder (!%p204_p10), %v389_v60, %v387_v61 }
  0x15   : > { %876 = vmatpush3.bf16.msra.mxu0 (!%p204_p10), %v875_v7 }
  0x16   : > { %s1183_s11 = scalar_select %p241_p11, %s1068_s18, 1  ;;  %909 = vmatprep.subr.bf16.mxu0 %v1078_v3 }
  0x18   : > { %s722_s12 = sshll.u32 %s1183_s11, 3  ;;  %s749_s22 = sshll.u32 %s1183_s11, 7 }
  0x19   : > { %s247_s21 = scalar_lea.vmem %s1330_s0, %s722_s12  ;;  %s1199_s29 = scalar_lea.vmem %s1331_s1, %s749_s22 }
  0x1a   : > { %v259_v8 = vld [vmem:[%s247_s21] sm:$0xff]  ;;  %v262_v12 = vld [vmem:[%s1199_s29 + $0x8] sm:$0xff]  ;;  %v263_v14 = vld [vmem:[%s1199_s29 + $0x10] sm:$0xff]  ;;  %s1252_s8 = scalar_lea.vmem %s1332_s2, %s749_s22  ;;  %s721_s11 = sshll.u32 %s238_s10, 3 }
  0x1b   : > { %v260_v9 = vmul.f32 0.17677669, %v259_v8  ;;  %v261_v11 = vld [vmem:[%s1199_s29] sm:$0xff]  ;;  %v264_v15 = vld [vmem:[%s1199_s29 + $0x18] sm:$0xff]  ;;  %v266_v18 = vld [vmem:[%s1199_s29 + $0x28] sm:$0xff]  ;;  %s746_s12 = sshll.u32 %s1068_s18, 7 }
  0x1c   : > { %v878_v13 = vpack.c.bf16 %v262_v12, %v261_v11  ;;  %v882_v16 = vpack.c.bf16 %v264_v15, %v263_v14  ;;  %v265_v17 = vld [vmem:[%s1199_s29 + $0x20] sm:$0xff]  ;;  %v267_v20 = vld [vmem:[%s1199_s29 + $0x30] sm:$0xff]  ;;  %v268_v21 = vld [vmem:[%s1199_s29 + $0x38] sm:$0xff]  ;;  %s240_s13 = scalar_lea.vmem [#allocation2], %s721_s11  ;;  %s1282_s24 = scalar_lea.hbm %s1334_s4, %s746_s12 }
  0x1d   : > { %799 = vmatmul.mubr.msk.f32.vlgmr.msra.gmra.mrb[0].mxu0 %vm281_vm1, %v260_v9  ;;  %v886_v19 = vpack.c.bf16 %v266_v18, %v265_v17  ;;  %v890_v22 = vpack.c.bf16 %v268_v21, %v267_v20  ;;  %v269_v23 = vld [vmem:[%s1199_s29 + $0x40] sm:$0xff]  ;;  %v270_v24 = vld [vmem:[%s1199_s29 + $0x48] sm:$0xff]  ;;  %v271_v26 = vld [vmem:[%s1199_s29 + $0x50] sm:$0xff]  ;;  %s621_s14 = sshll.u32 %s240_s13, 4  ;;  %s1284_s14 = int_to_ptr.vmem [resolvable:$true] %s621_s14 }
  0x1e   : > { %868 = vmatprep.mubr.msk.f32.mxu0 %vm1079_vm0, %v1080_v6  ;;  %880 = vmatpush3.bf16.xpose.msk.msra.mxu1 %vm1203_vm2, %v878_v13  ;;  %v894_v25 = vpack.c.bf16 %v270_v24, %v269_v23  ;;  %v272_v27 = vld [vmem:[%s1199_s29 + $0x58] sm:$0xff]  ;;  %v273_v29 = vld [vmem:[%s1199_s29 + $0x60] sm:$0xff]  ;;  %v274_v30 = vld [vmem:[%s1199_s29 + $0x68] sm:$0xff]  ;;  %s998_s18 = scalar_lea.vmem %s1284_s14, 128 }
  0x1f   : > { %881 = vmatprep.subr.bf16.mxu1 %v1078_v3  ;;  %v898_v28 = vpack.c.bf16 %v272_v27, %v271_v26  ;;  %v902_v31 = vpack.c.bf16 %v274_v30, %v273_v29  ;;  %v275_v32 = vld [vmem:[%s1199_s29 + $0x70] sm:$0xff]  ;;  %v276_v33 = vld [vmem:[%s1199_s29 + $0x78] sm:$0xff]  ;;  %v517_v44 = vld [vmem:[%s1252_s8] sm:$0xff]  ;;  %p999_p12 = scmp.ne.s32.totalorder %s1284_s14, %s998_s18  ;;  %s1084_s29 = smov [#allocation2]  }
  0x20   : > { %v906_v34 = vpack.c.bf16 %v276_v33, %v275_v32  ;;  %v518_v45 = vld [vmem:[%s1252_s8 + $0x8] sm:$0xff]  ;;  %v519_v46 = vld [vmem:[%s1252_s8 + $0x10] sm:$0xff]  ;;  %v520_v49 = vld [vmem:[%s1252_s8 + $0x18] sm:$0xff] }
  0x21   : > { %v910_v48 = vpack.c.bf16 %v518_v45, %v517_v44  ;;  %v913_v50 = vpack.c.bf16 %v520_v49, %v519_v46  ;;  %v521_v51 = vld [vmem:[%s1252_s8 + $0x20] sm:$0xff]  ;;  %v522_v52 = vld [vmem:[%s1252_s8 + $0x28] sm:$0xff]  ;;  %v523_v56 = vld [vmem:[%s1252_s8 + $0x30] sm:$0xff]  ;;  %p1000_p13 = pnand %p999_p12, %p1150_p4 }
  0x22   : > { %v916_v54 = vpack.c.bf16 %v522_v52, %v521_v51  ;;  %v524_v57 = vld [vmem:[%s1252_s8 + $0x38] sm:$0xff]  ;;  %v525_v2 = vld [vmem:[%s1252_s8 + $0x40] sm:$0xff]  ;;  %v526_v4 = vld [vmem:[%s1252_s8 + $0x48] sm:$0xff] }
  0x23   : > { %911 = vmatpush3.bf16.msra.mxu0 %v910_v48  ;;  %v919_v58 = vpack.c.bf16 %v524_v57, %v523_v56  ;;  %v922_v5 = vpack.c.bf16 %v526_v4, %v525_v2  ;;  %v527_v6 = vld [vmem:[%s1252_s8 + $0x50] sm:$0xff]  ;;  %v528_v7 = vld [vmem:[%s1252_s8 + $0x58] sm:$0xff]  ;;  %v530_v10 = vld [vmem:[%s1252_s8 + $0x68] sm:$0xff]  ;;  %p1001_p0 = pneg %p1000_p13 }
  0x24   : > { %912 = vmatprep.subr.bf16.mxu0 %v1078_v3  ;;  %v925_v8 = vpack.c.bf16 %v528_v7, %v527_v6  ;;  %v531_v12 = vld [vmem:[%s1252_s8 + $0x70] sm:$0xff]  ;;  %v532_v13 = vld [vmem:[%s1252_s8 + $0x78] sm:$0xff] }
  0x25   : > { %v931_v14 = vpack.c.bf16 %v532_v13, %v531_v12 }
  0x26   : > { %884 = vmatpush3.bf16.xpose.msk.msra.mxu1 %vm1203_vm2, %v882_v16 }
  0x27   : > { %885 = vmatprep.subr.bf16.mxu1 %v1078_v3  ;;  %914 = vmatpush3.bf16.msra.mxu0 %v913_v50 }
  0x28   : > { %915 = vmatprep.subr.bf16.mxu0 %v1078_v3 }
  0x2b   : > { %917 = vmatpush3.bf16.msra.mxu0 %v916_v54 }
  0x2c   : > { %918 = vmatprep.subr.bf16.mxu0 %v1078_v3 }
  0x2e   : > { %888 = vmatpush3.bf16.xpose.msk.msra.mxu1 %vm1203_vm2, %v886_v19 }
  0x2f   : > { %889 = vmatprep.subr.bf16.mxu1 %v1078_v3  ;;  %920 = vmatpush3.bf16.msra.mxu0 %v919_v58 }
  0x30   : > { %921 = vmatprep.subr.bf16.mxu0 %v1078_v3 }
  0x33   : > { %923 = vmatpush3.bf16.msra.mxu0 %v922_v5 }
  0x34   : > { %924 = vmatprep.subr.bf16.mxu0 %v1078_v3 }
  0x36   : > { %892 = vmatpush3.bf16.xpose.msk.msra.mxu1 %vm1203_vm2, %v890_v22 }
  0x37   : > { %893 = vmatprep.subr.bf16.mxu1 %v1078_v3  ;;  %926 = vmatpush3.bf16.msra.mxu0 %v925_v8 }
  0x38   : > { %927 = vmatprep.subr.bf16.mxu0 %v1078_v3 }
  0x3e   : > { %896 = vmatpush3.bf16.xpose.msk.msra.mxu1 %vm1203_vm2, %v894_v25 }
  0x3f   : > { %897 = vmatprep.subr.bf16.mxu1 %v1078_v3 }
  0x46   : > { %900 = vmatpush3.bf16.xpose.msk.msra.mxu1 %vm1203_vm2, %v898_v28 }
  0x47   : > { %901 = vmatprep.subr.bf16.mxu1 %v1078_v3 }
  0x4e   : > { %904 = vmatpush3.bf16.xpose.msk.msra.mxu1 %vm1203_vm2, %v902_v31 }
  0x4f   : > { %905 = vmatprep.subr.bf16.mxu1 %v1078_v3 }
  0x56   : > { %908 = vmatpush3.bf16.xpose.msk.msra.mxu1 %vm1203_vm2, %v906_v34 }
  0x5d   : > { %834 = vmatmul.mubr.msk.f32.vlgmr.msra.gmra.mrb[0].mxu1 %vm281_vm1, %v260_v9  ;;  %v529_v9 = vld [vmem:[%s1252_s8 + $0x60] sm:$0xff] }
  0x5e   : > { %v928_v11 = vpack.c.bf16 %v530_v10, %v529_v9 }
  0x60   : > { %929 = vmatpush3.bf16.msra.mxu0 %v928_v11 }
  0x61   : > { %930 = vmatprep.subr.bf16.mxu0 %v1078_v3 }
  0x64   : > { %932 = vmatpush3.bf16.msra.mxu0 %v931_v14 }
  0xf0   : > { %v351_v35 = vpop.f32.mrb[0].mxu0 }
  0xf1   : > { %358 = vrot.lane.b32.xlu0 %v351_v35, %s1081_s30  ;;  %v800_v36 = vpop.f32.mrb[1].mxu0  ;;  %s1002_s30 = sshll.u32 %s1084_s29, 4  ;;  %s1003_s30 = int_to_ptr.vmem [resolvable:$false] %s1002_s30 }
  0xf2   : > { %p1005_p1 = scmp.lt.s32.totalorder %s1284_s14, %s1003_s30 }
 0x130   : > { %v505_v42 = vpop.f32.mrb[0].mxu1 }
 0x131   : > { %v835_v43 = vpop.f32.mrb[1].mxu1 }
 0x163   : > { %v359_v40 = vpop.permute.xlu0 %358 }
 0x164   : > { %v365_v41 = vsel %vm362_vm3, %v359_v40, %v351_v35 }
 0x165   : > { %367 = vrot.lane.b32.xlu0 %v365_v41, %s1082_s5  ;;  %s1004_s5 = scalar_lea.vmem %s1003_s30, 256 }
 0x166   : > { %p1006_p2 = scmp.lt.s32.totalorder %s1004_s5, %s998_s18 }
 0x168   : > { %p1007_p3 = por %p1006_p2, %p1005_p1 }
 0x16a   : > { %p1008_p5 = pnand %p1007_p3, %p1001_p0 }
 0x1d7   : > { %v368_v53 = vpop.permute.xlu0 %367 }
 0x1d8   : > { %v374_v55 = vsel %vm371_vm4, %v368_v53, %v365_v41 }
 0x1d9   : > { %376 = vrot.lane.b32.xlu1 %v374_v55, %s1083_s9 }
 0x24b   : > { %v377_v62 = vpop.permute.xlu1 %376 }
 0x24c   : > { %v383_v63 = vsel %vm380_vm6, %v377_v62, %v374_v55 }
 0x24d   : > { %v506_v0 = vadd.f32 %v505_v42, %v383_v63 }
 0x24f   : > { %v509_v1 = vsel %vm390_vm7, %v506_v0, -inf }
 0x250   : > { %510 = vmax.xlane.f32.xlu1 %v509_v1 }
 0x2dd   : > { %v511_v15 = vpop.xlane.xlu1 %510 }
 0x2de   : > { %v512_v16 = vsub.f32 %v509_v1, %v511_v15 }
 0x2e0   : > { %v513_v17 = vmul.f32 1.442695, %v512_v16 }
 0x2e2   : > { %994 = vpow2.f32 %v513_v17 }
 0x2ec   : > { %v995_v18 = vpop.eup %994 }
 0x2ed   : > { %515 = vadd.xlane.f32.xlu0 %v995_v18  ;;  %869 = vmatmul.mubr.f32.vlgmr.msra.gmra.mrb[2].mxu0 %v995_v18 }
 0x37a   : > { %v516_v19 = vpop.xlane.xlu0 %515 }
 0x37b   : > { %996 = vrcp.f32 %v516_v19 }
 0x385   : > { %v997_v20 = vpop.eup %996 }
 0x3c0   : > { %v599_v21 = vpop.f32.mrb[2].mxu0 }
 0x3c1   : > { %v604_v22 = vmul.f32 %v997_v20, %v599_v21  ;;  %v870_v3 = vpop.f32.mrb[3].mxu0 }
 0x3c3   : > { %605 = vst.msk [vmem:[%s240_s13] sm:$0xff] %vm281_vm1, %v604_v22 }
 0x3c4   : > { %1011 = shalt.err (!%p1008_p5)
}
 0x3c5   : > { %s1012_s6 = scalar_lea.hbm %s1282_s24, 128  ;;  %s1016_s9 = scalar_lea.hbm %s1334_s4, 256 }
 0x3c6   : > { %p1013_p6 = scmp.ne.s32.totalorder %s1282_s24, %s1012_s6  ;;  %p1017_p10 = scmp.lt.u32.totalorder %s1282_s24, %s1334_s4 }
 0x3c7   : > { %p1018_p11 = scmp.lt.u32.totalorder %s1016_s9, %s1012_s6  ;;  %p1020_p13 = scmp.lt.u32.totalorder %s1012_s6, %s1282_s24 }
 0x3c8   : > { %p1014_p7 = pnand %p1013_p6, %p1150_p4 }
 0x3c9   : > { %p1019_p12 = por %p1018_p11, %p1017_p10 }
 0x3ca   : > { %p1015_p9 = pneg %p1014_p7 }
 0x3cb   : > { %p1021_p0 = por %p1020_p13, %p1019_p12 }
 0x3cd   : > { %p1022_p1 = pnand %p1021_p0, %p1015_p9 }
 0x3cf   : > { %1025 = shalt.err (!%p1022_p1)
}
 0x3d0   : > { %933 = dma.vmem_to_hbm [thread:$0]  (%p1150_p4), %s1284_s14, 128, %s1282_s24, %s607_s26  }
 0x3d1 PF: > { %p939_p2 = scmp.ge.s32.totalorder %s1076_s20, 2  ;;  %s633_s12 = sand.u32 1, %s1056_s15  }
 0x3d2   : > { %s634_s13 = scalar_lea.sflag [#allocation3], %s633_s12 }
 0x3d3   : > { %p936_p3 = pnand %p939_p2, %p1157_p8 }
 0x3d5   : > { %1051 = dma.done.wait (!%p936_p3), %s634_s13, 128  }
 0x3d6   : > { %1053 = vsyncadd (!%p936_p3), %s634_s13, 4294967168  ;;  %s17_s20 = sadd.s32 1, %s1076_s20   ;;  %s1339_s15 = smov %s1060_s16 }
 0x3d7   : > { %p14_p5 = scmp.ge.s32.totalorder %s17_s20, 4   ;;  %s1340_s16 = smov %s1064_s17 }
 0x3d8   : > { %s1341_s17 = smov %s1163_s28  ;;  %s1342_s18 = smov %s1072_s19 }
 0x3d9   : > { %s1343_s19 = smov %s1345_s23  ;;  %16 = sbr.rel (!%p14_p5) target bundleno = 4 (0x4), region = 77 }
 0x3e0   :  { %639 = vsyncpa [#allocation3], 1 }
 0x3e1   :  { %641 = vsyncpa [#allocation3 + $0x1], 1 }

</bundles_post_ra>
